<compile_context>
chip_gen: v5e
topology: v5e:2x2
jax: 0.10.0
libtpu: 0.0.40
codegen_flags: <defaults>
</compile_context>

<pallas_src>
import jax
import jax.numpy as jnp
from jax import lax
from jax.experimental import pallas as pl
from jax.experimental.pallas import tpu as pltpu

TEMPERATURE = 0.07
INV_TEMPERATURE = 1.0 / TEMPERATURE
EPS = 1e-12  # matches torch.nn.functional.normalize default eps


def _round_up(x: int, m: int) -> int:
    return ((x + m - 1) // m) * m


def _round_down(x: int, m: int) -> int:
    return (x // m) * m


# --------------------------------------------------------------------------
# Kernel: one (tm, D) model-output tile x one (tn_or_Lpad, D) label tile.
# Model-output normalization + temperature are folded into a per-row scale
# applied after the MXU matmul (f32 accumulation, raw-dtype operands).
# --------------------------------------------------------------------------
def _label_embedding_kernel(x_ref, wn_ref, o_ref):
    xf = x_ref[...].astype(jnp.float32)
    sumsq = jnp.sum(xf * xf, axis=1, keepdims=True)
    # torch: x / max(||x||, eps)  ==  x * rsqrt(max(sumsq, eps^2));  fold 1/T in.
    inv = lax.rsqrt(jnp.maximum(sumsq, EPS * EPS)) * INV_TEMPERATURE
    # Raw similarity on the MXU: contract the embedding dim of both operands
    # directly (no transpose of the label tile).
    s = lax.dot_general(
        x_ref[...], wn_ref[...],
        dimension_numbers=(((1,), (1,)), ((), ())),
        preferred_element_type=jnp.float32)
    o_ref[...] = (s * inv).astype(o_ref.dtype)


# --------------------------------------------------------------------------
# Generation-aware VMEM budgets.
# --------------------------------------------------------------------------
def _vmem_budgets():
    try:
        cap = int(pltpu.get_tpu_info().vmem_capacity_bytes)
    except Exception:
        cap = 64 * 1024 * 1024  # assume the smallest per-core VMEM (v7x)
    tile_budget = min(cap // 2, 48 * 1024 * 1024)       # for sizing tiles
    scoped_limit = min((cap * 3) // 4, 100 * 1024 * 1024)  # vmem_limit_bytes
    return tile_budget, scoped_limit


# --------------------------------------------------------------------------
# Module-init-time work (label table is a fixed parameter): normalize once,
# pad the label axis to a multiple of 128 (zero rows -> zero logits, sliced
# away later) and cast to the MXU operand dtype.
# --------------------------------------------------------------------------
def precompute_normalized_labels(label_embeddings: jax.Array,
                                 *, compute_dtype=jnp.bfloat16) -> jax.Array:
    lf = label_embeddings.astype(jnp.float32)
    norm = jnp.sqrt(jnp.sum(lf * lf, axis=1, keepdims=True))
    wn = lf / jnp.maximum(norm, EPS)
    L = wn.shape[0]
    L_pad = _round_up(L, 128)
    if L_pad != L:
        wn = jnp.pad(wn, ((0, L_pad - L), (0, 0)))
    return wn.astype(compute_dtype)


# --------------------------------------------------------------------------
# Forward: model_output [B, D], normalized_labels [L_pad, D] (pre-normalized,
# pre-padded, any dtype) -> logits [B, num_labels] (f32 by default).
# --------------------------------------------------------------------------
def label_embedding_forward(model_output: jax.Array,
                            normalized_labels: jax.Array,
                            num_labels: int | None = None,
                            *,
                            out_dtype=jnp.float32,
                            vmem_budget_bytes: int | None = None) -> jax.Array:
    B, D = model_output.shape
    if num_labels is None:
        num_labels = normalized_labels.shape[0]

    wn = normalized_labels
    L_pad = _round_up(wn.shape[0], 128)
    if L_pad != wn.shape[0]:  # defensive: table not pre-padded at init
        wn = jnp.pad(wn, ((0, L_pad - wn.shape[0]), (0, 0)))
    assert wn.shape[1] == D, "embedding_dim mismatch"

    compute_dtype = wn.dtype
    x = model_output.astype(compute_dtype)

    x_bytes = jnp.dtype(compute_dtype).itemsize
    wn_bytes = x_bytes
    out_bytes = jnp.dtype(out_dtype).itemsize

    budget, scoped_limit = _vmem_budgets()
    if vmem_budget_bytes is not None:
        budget = vmem_budget_bytes

    granule = 16 if x_bytes < 4 else 8   # bf16 packs 2 rows per sublane
    B_g = _round_up(B, granule)

    def pick_tm(tm_cap):
        tm_cap = max(granule, min(1024, _round_down(tm_cap, granule)))
        num_tiles = pl.cdiv(B_g, tm_cap)
        # Guarantee >=2 batch tiles once there is enough work (v7x dual-TC).
        if num_tiles == 1 and B_g >= 256:
            num_tiles = 2
        tm = _round_up(pl.cdiv(B_g, num_tiles), granule)
        return tm, num_tiles

    # ---- choose tiling (count every operand as double-buffered) ----------
    wn_resident_bytes = 2 * L_pad * D * wn_bytes
    per_row_resident = 2 * (D * x_bytes + L_pad * out_bytes)
    resident = (wn_resident_bytes <= budget // 2 and
                (budget - wn_resident_bytes) // per_row_resident >= granule)

    if resident:
        # Label table stays in VMEM for the whole kernel; 1-D grid over batch.
        tm, num_m = pick_tm((budget - wn_resident_bytes) // per_row_resident)
        tn = L_pad
        grid = (num_m,)
        in_specs = [pl.BlockSpec((tm, D), lambda i: (i, 0)),
                    pl.BlockSpec((L_pad, D), lambda i: (0, 0))]
        out_specs = pl.BlockSpec((tm, L_pad), lambda i: (i, 0))
        dim_sem = ("parallel",)
        label_reads = 1
    else:
        # Fallback: tile the label axis too; maximize tm (label-table HBM
        # re-reads scale as 1/tm).
        tn = 128
        for cand in (512, 384, 256):
            if L_pad % cand == 0 and 2 * cand * D * wn_bytes <= budget // 4:
                tn = cand
                break
        rem = budget - 2 * tn * D * wn_bytes
        per_row = 2 * (D * x_bytes + tn * out_bytes)
        tm, num_m = pick_tm(max(granule, rem // per_row))
        grid = (num_m, L_pad // tn)
        in_specs = [pl.BlockSpec((tm, D), lambda i, j: (i, 0)),
                    pl.BlockSpec((tn, D), lambda i, j: (j, 0))]
        out_specs = pl.BlockSpec((tm, tn), lambda i, j: (i, j))
        dim_sem = ("parallel", "parallel")
        label_reads = num_m

    B_pad = num_m * tm
    if B_pad != B:
        x = jnp.pad(x, ((0, B_pad - B), (0, 0)))

    out = pl.pallas_call(
        _label_embedding_kernel,
        out_shape=jax.ShapeDtypeStruct((B_pad, L_pad), out_dtype),
        grid_spec=pltpu.PrefetchScalarGridSpec(
            num_scalar_prefetch=0,
            grid=grid,
            in_specs=in_specs,
            out_specs=out_specs),
        compiler_params=pltpu.CompilerParams(
            dimension_semantics=dim_sem,
            vmem_limit_bytes=scoped_limit),
        cost_estimate=pl.CostEstimate(
            flops=2 * B_pad * L_pad * D,
            transcendentals=B_pad * (L_pad // tn),
            bytes_accessed=(B_pad * D * x_bytes
                            + label_reads * L_pad * D * wn_bytes
                            + B_pad * L_pad * out_bytes)),
    )(x, wn)

    return out[:B, :num_labels]


def reference_forward(model_output, label_embeddings):
    """Pure-JAX reference matching the PyTorch module (normalizes both inputs)."""
    xn = model_output / jnp.maximum(
        jnp.linalg.norm(model_output, axis=1, keepdims=True), EPS)
    wn = label_embeddings / jnp.maximum(
        jnp.linalg.norm(label_embeddings, axis=1, keepdims=True), EPS)
    return (xn @ wn.T) / TEMPERATURE


if __name__ == "__main__":
    # Deterministic synthetic parameters / inputs.
    # TODO(synk): embedding_model.embed(label) text embedding at __init__ has no
    # Pallas equivalent; synthesized with random vectors instead.
    key = jax.random.PRNGKey(0)
    k_x, k_w = jax.random.split(key)

    batch_size = 8          # batch of model outputs
    embedding_dim = 32      # embedding_model.embedding_dim
    num_labels = 4          # len(labels)

    model_output = jax.random.normal(k_x, (batch_size, embedding_dim), jnp.float32)
    label_embeddings = jax.random.normal(k_w, (num_labels, embedding_dim), jnp.float32)

    expected = reference_forward(model_output, label_embeddings)

    # 1) f32 operands, resident-label fast path — tight tolerance.
    wn_f32 = precompute_normalized_labels(label_embeddings, compute_dtype=jnp.float32)
    logits_f32 = jax.block_until_ready(
        label_embedding_forward(model_output, wn_f32, num_labels))
    assert logits_f32.shape == (batch_size, num_labels)
    assert jnp.allclose(logits_f32, expected, atol=1e-4, rtol=1e-4), "f32 mismatch"

    # 2) bf16 MXU operands (default production config) — bf16-level tolerance.
    wn_bf16 = precompute_normalized_labels(label_embeddings)   # bf16 by default
    logits_bf16 = jax.block_until_ready(
        label_embedding_forward(model_output, wn_bf16, num_labels))
    assert logits_bf16.shape == (batch_size, num_labels)
    assert jnp.allclose(logits_bf16, expected, atol=0.2, rtol=0.02), "bf16 mismatch"

    # 3) force the tiled (non-resident label table) fallback path.
    logits_tiled = jax.block_until_ready(
        label_embedding_forward(model_output, wn_f32, num_labels,
                                vmem_budget_bytes=48 * 1024))
    assert jnp.allclose(logits_tiled, expected, atol=1e-4, rtol=1e-4), "tiled mismatch"

    print("KERNEL_OK")
</pallas_src>

<mosaic_0001>
module attributes {stable_mosaic.version = 11 : i64} {
  func.func @_label_embedding_kernel(%arg0: i32, %arg1: memref<8x32xf32, #tpu.memory_space<vmem>>, %arg2: memref<128x32xf32, #tpu.memory_space<vmem>>, %arg3: memref<8x128xf32, #tpu.memory_space<vmem>>) attributes {dimension_semantics = [#tpu.dimension_semantics<parallel>], iteration_bounds = array<i64: 1>, scalar_prefetch = 0 : i64, scratch_operands = 0 : i64, tpu.core_type = #tpu.core_type<tc>, window_params = [{transform_indices = @transform_0, window_bounds = array<i64: 8, 32>}, {pipeline_mode = #tpu.pipeline_mode<synchronous>, transform_indices = @transform_1, window_bounds = array<i64: 128, 32>}, {transform_indices = @transform_2, window_bounds = array<i64: 8, 128>}]} {
    %c0 = arith.constant 0 : index
    %c0_0 = arith.constant 0 : index
    %0 = vector.load %arg1[%c0, %c0_0] : memref<8x32xf32, #tpu.memory_space<vmem>>, vector<8x32xf32>
    %1 = arith.mulf %0, %0 : vector<8x32xf32>
    %cst = arith.constant dense<0.000000e+00> : vector<8xf32>
    %2 = vector.multi_reduction <add>, %1, %cst [1] : vector<8x32xf32> to vector<8xf32>
    %3 = vector.shape_cast %2 : vector<8xf32> to vector<8x1xf32>
    %cst_1 = arith.constant 1.000000e-24 : f32
    %4 = vector.broadcast %cst_1 : f32 to vector<8x1xf32>
    %5 = arith.maximumf %3, %4 : vector<8x1xf32>
    %6 = math.rsqrt %5 : vector<8x1xf32>
    %cst_2 = arith.constant 14.2857141 : f32
    %7 = vector.broadcast %cst_2 : f32 to vector<8x1xf32>
    %8 = arith.mulf %6, %7 : vector<8x1xf32>
    %c0_3 = arith.constant 0 : index
    %c0_4 = arith.constant 0 : index
    %9 = vector.load %arg1[%c0_3, %c0_4] : memref<8x32xf32, #tpu.memory_space<vmem>>, vector<8x32xf32>
    %c0_5 = arith.constant 0 : index
    %c0_6 = arith.constant 0 : index
    %10 = vector.load %arg2[%c0_5, %c0_6] : memref<128x32xf32, #tpu.memory_space<vmem>>, vector<128x32xf32>
    %cst_7 = arith.constant dense<0.000000e+00> : vector<8x128xf32>
    %11 = tpu.matmul %9, %10, %cst_7 {dimension_numbers = #tpu.dot_dimension_numbers<[1], [1], [0], [0], [0, 0, 1, 0], [], []>} : vector<8x32xf32>, vector<128x32xf32>, vector<8x128xf32> -> vector<8x128xf32>
    %12 = vector.broadcast %8 : vector<8x1xf32> to vector<8x128xf32>
    %13 = arith.mulf %11, %12 : vector<8x128xf32>
    %c0_8 = arith.constant 0 : index
    %c0_9 = arith.constant 0 : index
    %14 = vector.load %arg3[%c0_8, %c0_9] : memref<8x128xf32, #tpu.memory_space<vmem>>, vector<8x128xf32>
    tpu.vector_store %arg3[%c0_8, %c0_9], %13 {strides = array<i32>} : memref<8x128xf32, #tpu.memory_space<vmem>>, vector<8x128xf32>,
    return
  }
  func.func @transform_0(%arg0: i32) -> (i32, i32) {
    %c0_i32 = arith.constant 0 : i32
    %c0_i32_0 = arith.constant 0 : i32
    return %arg0, %c0_i32 : i32, i32
  }
  func.func @transform_1(%arg0: i32) -> (i32, i32) {
    %c0_i32 = arith.constant 0 : i32
    %c0_i32_0 = arith.constant 0 : i32
    %c0_i32_1 = arith.constant 0 : i32
    return %c0_i32, %c0_i32_0 : i32, i32
  }
  func.func @transform_2(%arg0: i32) -> (i32, i32) {
    %c0_i32 = arith.constant 0 : i32
    %c0_i32_0 = arith.constant 0 : i32
    return %arg0, %c0_i32 : i32, i32
  }
}

</mosaic_0001>

<bundles_post_ra>
// kernel: tpu_custom_call.1
= control target key start
LH: loop header
LB: loop body
LE: loop exit
PB: predicated region body
PF: predicated region fallthrough
CT: control target
= control target key end

     0   :  { %vm14_vm0 = vcmask 261120   ;;  %s269_s0 = inlined_call_operand.vmem [shape: f32[8,32], index: 0, kind: input, shape index: {}]   ;;  %s270_s1 = inlined_call_operand.vmem [shape: f32[128,32], index: 1, kind: input, shape index: {}]   ;;  %s271_s2 = inlined_call_operand.hbm [shape: f32[8,128], index: 2, kind: output, shape index: {}]  }
   0x1   :  { %v45_v0 = vld [vmem:[%s270_s1 + $0x78] sm:$0xff]  ;;  %v44_v1 = vld [vmem:[%s270_s1 + $0x70] sm:$0xff]  ;;  %v12_v2 = vld [vmem:[%s269_s0] sm:$0xff] }
   0x2   :  { %135 = vmatpush.xpose.msk.msra.mxu0 %vm14_vm0, %v45_v0 }
   0x3   :  { %7 = vsyncpa [#allocation3], 0  ;;  %v13_v3 = vmul.f32 %v12_v2, %v12_v2  ;;  %v43_v4 = vld [vmem:[%s270_s1 + $0x68] sm:$0xff]  ;;  %v42_v6 = vld [vmem:[%s270_s1 + $0x60] sm:$0xff]  ;;  %s181_s14 = smov [#allocation2]   ;;  %s126_s17 = sshll.u32 %s271_s2, 4  ;;  %s127_s17 = int_to_ptr.hbm [resolvable:$true] %s126_s17 }
   0x4   :  { %v41_v7 = vld [vmem:[%s270_s1 + $0x58] sm:$0xff]  ;;  %v40_v8 = vld [vmem:[%s270_s1 + $0x50] sm:$0xff]  ;;  %v39_v9 = vld [vmem:[%s270_s1 + $0x48] sm:$0xff]  ;;  %s124_s15 = sshll.u32 %s181_s14, 4  ;;  %s125_s15 = int_to_ptr.vmem [resolvable:$true] %s124_s15 }
   0x5   :  { %v15_v5 = vsel %vm14_vm0, %v13_v3, 0.0  ;;  %v38_v10 = vld [vmem:[%s270_s1 + $0x40] sm:$0xff]  ;;  %v37_v11 = vld [vmem:[%s270_s1 + $0x38] sm:$0xff]  ;;  %v36_v12 = vld [vmem:[%s270_s1 + $0x30] sm:$0xff] }
   0x6   :  { %136 = vmatpush.xpose.msk.msra.mxu0 %vm14_vm0, %v44_v1  ;;  %16 = vadd.xlane.f32.xlu0 %v15_v5  ;;  %v35_v13 = vld [vmem:[%s270_s1 + $0x28] sm:$0xff]  ;;  %v34_v14 = vld [vmem:[%s270_s1 + $0x20] sm:$0xff]  ;;  %v33_v15 = vld [vmem:[%s270_s1 + $0x18] sm:$0xff] }
   0x7   :  { %v32_v16 = vld [vmem:[%s270_s1 + $0x10] sm:$0xff]  ;;  %v31_v17 = vld [vmem:[%s270_s1 + $0x8] sm:$0xff]  ;;  %v30_v18 = vld [vmem:[%s270_s1] sm:$0xff] }
   0xa   :  { %137 = vmatpush.xpose.msk.msra.mxu0 %vm14_vm0, %v43_v4 }
   0xe   :  { %138 = vmatpush.xpose.msk.msra.mxu0 %vm14_vm0, %v42_v6 }
  0x12   :  { %139 = vmatpush.xpose.msk.msra.mxu0 %vm14_vm0, %v41_v7 }
  0x16   :  { %140 = vmatpush.xpose.msk.msra.mxu0 %vm14_vm0, %v40_v8 }
  0x1a   :  { %141 = vmatpush.xpose.msk.msra.mxu0 %vm14_vm0, %v39_v9 }
  0x1e   :  { %142 = vmatpush.xpose.msk.msra.mxu0 %vm14_vm0, %v38_v10 }
  0x22   :  { %143 = vmatpush.xpose.msk.msra.mxu0 %vm14_vm0, %v37_v11 }
  0x26   :  { %144 = vmatpush.xpose.msk.msra.mxu0 %vm14_vm0, %v36_v12 }
  0x2a   :  { %145 = vmatpush.xpose.msk.msra.mxu0 %vm14_vm0, %v35_v13 }
  0x2e   :  { %146 = vmatpush.xpose.msk.msra.mxu0 %vm14_vm0, %v34_v14 }
  0x32   :  { %147 = vmatpush.xpose.msk.msra.mxu0 %vm14_vm0, %v33_v15 }
  0x36   :  { %148 = vmatpush.xpose.msk.msra.mxu0 %vm14_vm0, %v32_v16 }
  0x3a   :  { %149 = vmatpush.xpose.msk.msra.mxu0 %vm14_vm0, %v31_v17 }
  0x3e   :  { %150 = vmatpush.xpose.msk.msra.mxu0 %vm14_vm0, %v30_v18 }
  0x41   :  { %151 = vmatmul.msk.f32.vlgmr.msra.gmra.mxu0 %vm14_vm0, %v12_v2 }
  0x79   :  { %v17_v19 = vpop.xlane.xlu0 %16 }
  0x7a   :  { %v18_v20 = vmax.f32 %v17_v19, 1e-24 }
  0x7c   :  { %153 = vrsqrt.f32 %v18_v20  ;;  %vm25_vm1 = vweird.f32 %v18_v20 }
  0x82   :  { %v154_v21 = vpop.eup %153 }
  0x83   :  { %v20_v22 = vmul.f32 %v154_v21, %v18_v20  ;;  %vm26_vm2 = vweird.f32 %v154_v21 }
  0x84   :  { %vm27_vm3 = vmor %vm25_vm1, %vm26_vm2 }
  0x85   :  { %v21_v23 = vmul.f32 %v154_v21, %v20_v22 }
  0x87   :  { %v22_v24 = vmul.f32 0.5, %v21_v23 }
  0x89   :  { %v23_v25 = vsub.f32 1.5, %v22_v24 }
  0x8b   :  { %v24_v26 = vmul.f32 %v154_v21, %v23_v25 }
  0x8d   :  { %v28_v27 = vsel %vm27_vm3, %v154_v21, %v24_v26 }
  0x8e   :  { %v29_v28 = vmul.f32 14.285714, %v28_v27 }
  0xbe   :  { %v114_v29 = vpop.f32.mrf.mxu0 }
  0xbf   :  { %v117_v30 = vmul.f32 %v114_v29, %v29_v28 }
  0xc1   :  { %118 = vst [vmem:[#allocation2] sm:$0xff] %v117_v30 }
  0xc2   :  { %129 = dma.vmem_to_hbm [thread:$0]  %s125_s15, 128, %s127_s17, [#allocation3]  }
  0xc3   :  { %179 = dma.done.wait [#allocation3], 128  }
  0xc4   :  { %180 = vsyncadd [#allocation3], 4294967168 }
  0xc5   :  { %134 = vsyncpa [#allocation3], 1 }

</bundles_post_ra>
